<compile_context>
chip_gen: v5e
topology: v5e:2x2
jax: 0.10.0
libtpu: 0.0.40
codegen_flags: <defaults>
</compile_context>

<pallas_src>
import functools

import jax
import jax.numpy as jnp
from jax.experimental import pallas as pl
from jax.experimental.pallas import tpu as pltpu


_TM_MAX = 4096   # max rows per M tile (review: 2048-4096 pays off on v6e/v7x)
_TN_MAX = 1024   # weight/output column tile for large label counts (mult of 256)


def _round_up(x: int, m: int) -> int:
    return ((x + m - 1) // m) * m


def _vmem_capacity_bytes() -> int:
    """Physical VMEM per TensorCore; conservative fallback if query fails."""
    try:
        info = pltpu.get_tpu_info()
        cap = getattr(info, "vmem_capacity_bytes", None)
        if cap:
            return int(cap)
    except Exception:
        pass
    return 64 * 1024 * 1024  # v7x per-TC size — safe lower bound everywhere


def _onevsall_kernel(x_ref, w_ref, o_ref):
    # (tm, d) @ (d, tn) -> (tm, tn), f32 accumulation on the MXU.
    res = jnp.dot(x_ref[...], w_ref[...], preferred_element_type=jnp.float32)
    # When the label dimension is tiny (single column tile), the weight block is
    # lane-padded but the output is not: store only the valid columns.
    o_ref[...] = res[:, : o_ref.shape[1]].astype(o_ref.dtype)


@functools.partial(jax.jit, static_argnames=("out_dtype",))
def one_vs_all(x: jax.Array, weight: jax.Array, *, out_dtype=jnp.float32) -> jax.Array:
    """x: (n, l, d); weight: (d, num_labels, 2) -> logits (n, l, num_labels, 2)."""
    n, l, d = x.shape
    d_w, num_labels, b = weight.shape
    assert d == d_w and b == 2

    M = n * l
    CB = num_labels * b

    # ---- layout plumbing (under jit: reshape of contiguous x is a bitcast) ----
    x2d = x.reshape(M, d)
    # Flatten (c, b) in the same order as the 'dcb' einsum; match x's dtype so
    # bf16 activations (if the caller provides them) hit the MXU natively.
    w2d = weight.reshape(d, CB).astype(x.dtype)

    # Column tiling of the weight / output.  For small CB this is one padded
    # weight tile (output stays unpadded); for large CB it becomes an N axis.
    tn = min(_round_up(CB, 128), _TN_MAX)
    CBw = _round_up(CB, tn)
    if CBw != CB:
        # Pad only the tiny weight (zeros); the output is never column-padded.
        w2d = jnp.pad(w2d, ((0, 0), (0, CBw - CB)))
    n_tiles = CBw // tn
    out_cols = CB if n_tiles == 1 else tn

    in_bytes = x2d.dtype.itemsize
    out_bytes = jnp.dtype(out_dtype).itemsize

    # ---- per-generation M tile from a VMEM budget (no padded copy of x) ----
    vmem_cap = _vmem_capacity_bytes()
    budget = max(16 * 2**20, min(vmem_cap // 2, 64 * 2**20))
    fixed_bytes = 2 * d * tn * in_bytes                      # double-buffered weight tile
    per_row_bytes = 2 * d * in_bytes + 2 * out_cols * out_bytes
    tm = max(8, min(_TM_MAX, (budget - fixed_bytes) // per_row_bytes))
    tm = (tm // 8) * 8
    tm = min(tm, _round_up(M, 8))

    m_tiles = pl.cdiv(M, tm)   # ragged last block handled by Pallas, no jnp.pad(x)

    working = 2 * tm * d * in_bytes + fixed_bytes + 2 * tm * out_cols * out_bytes
    vmem_limit = int(min(max(2 * working, 32 * 2**20), vmem_cap * 7 // 8))

    cost = pl.CostEstimate(
        flops=2 * M * d * CBw,
        transcendentals=0,
        bytes_accessed=M * d * in_bytes + d * CBw * in_bytes + M * CB * out_bytes,
    )

    out2d = pl.pallas_call(
        _onevsall_kernel,
        out_shape=jax.ShapeDtypeStruct((M, CB), out_dtype),
        grid=(m_tiles, n_tiles),
        in_specs=[
            # x: one (tm, d) tile per M step; constant over the CB axis, so it
            # stays VMEM-resident while the column tiles stream.
            pl.BlockSpec((tm, d), lambda i, j: (i, 0)),
            # weight: (d, tn) column tile (the whole slab never needs to fit VMEM).
            pl.BlockSpec((d, tn), lambda i, j: (0, j)),
        ],
        out_specs=pl.BlockSpec((tm, out_cols), lambda i, j: (i, j)),
        compiler_params=pltpu.CompilerParams(
            # M tiles split across v7x's two TensorCores; CB axis kept innermost.
            dimension_semantics=("parallel", "arbitrary"),
            vmem_limit_bytes=vmem_limit,
        ),
        cost_estimate=cost,
    )(x2d, w2d)

    return out2d.reshape(n, l, num_labels, b)


if __name__ == "__main__":
    key = jax.random.PRNGKey(0)
    k_x, k_w = jax.random.split(key)

    n, l, d = 2, 8, 768          # hidden dim fixed to 768 by the module
    num_labels = 8

    x = jax.random.normal(k_x, (n, l, d), dtype=jnp.float32)
    weight = jax.random.normal(k_w, (d, num_labels, 2), dtype=jnp.float32)

    logits = one_vs_all(x, weight)
    logits = jax.block_until_ready(logits)

    # Sanity check against plain-JAX einsum reference (f32 path).
    ref = jnp.einsum("nld,dcb->nlcb", x, weight)
    assert logits.shape == (n, l, num_labels, 2)
    assert jnp.allclose(logits, ref, atol=1e-3, rtol=1e-3)

    print("KERNEL_OK")
</pallas_src>

<mosaic_0001>
module attributes {stable_mosaic.version = 11 : i64} {
  func.func @_onevsall_kernel(%arg0: i32, %arg1: i32, %arg2: memref<16x768xf32, #tpu.memory_space<vmem>>, %arg3: memref<768x128xf32, #tpu.memory_space<vmem>>, %arg4: memref<16x16xf32, #tpu.memory_space<vmem>>) attributes {dimension_semantics = [#tpu.dimension_semantics<parallel>, #tpu.dimension_semantics<arbitrary>], iteration_bounds = array<i64: 1, 1>, scalar_prefetch = 0 : i64, scratch_operands = 0 : i64, tpu.core_type = #tpu.core_type<tc>, window_params = [{transform_indices = @transform_0, window_bounds = array<i64: 16, 768>}, {transform_indices = @transform_1, window_bounds = array<i64: 768, 128>}, {transform_indices = @transform_2, window_bounds = array<i64: 16, 16>}]} {
    %c0 = arith.constant 0 : index
    %c0_0 = arith.constant 0 : index
    %0 = vector.load %arg2[%c0, %c0_0] : memref<16x768xf32, #tpu.memory_space<vmem>>, vector<16x768xf32>
    %c0_1 = arith.constant 0 : index
    %c0_2 = arith.constant 0 : index
    %1 = vector.load %arg3[%c0_1, %c0_2] : memref<768x128xf32, #tpu.memory_space<vmem>>, vector<768x128xf32>
    %cst = arith.constant dense<0.000000e+00> : vector<16x128xf32>
    %2 = tpu.matmul %0, %1, %cst {dimension_numbers = #tpu.dot_dimension_numbers<[1], [0], [0], [1], [0, 0, 1, 1], [], []>} : vector<16x768xf32>, vector<768x128xf32>, vector<16x128xf32> -> vector<16x128xf32>
    %3 = vector.extract_strided_slice %2 {offsets = [0, 0], sizes = [16, 16], strides = [1, 1]} : vector<16x128xf32> to vector<16x16xf32>
    %c0_3 = arith.constant 0 : index
    %c0_4 = arith.constant 0 : index
    %4 = vector.load %arg4[%c0_3, %c0_4] : memref<16x16xf32, #tpu.memory_space<vmem>>, vector<16x16xf32>
    tpu.vector_store %arg4[%c0_3, %c0_4], %3 {strides = array<i32>} : memref<16x16xf32, #tpu.memory_space<vmem>>, vector<16x16xf32>,
    return
  }
  func.func @transform_0(%arg0: i32, %arg1: i32) -> (i32, i32) {
    %c0_i32 = arith.constant 0 : i32
    %c0_i32_0 = arith.constant 0 : i32
    return %arg0, %c0_i32 : i32, i32
  }
  func.func @transform_1(%arg0: i32, %arg1: i32) -> (i32, i32) {
    %c0_i32 = arith.constant 0 : i32
    %c0_i32_0 = arith.constant 0 : i32
    return %c0_i32, %arg1 : i32, i32
  }
  func.func @transform_2(%arg0: i32, %arg1: i32) -> (i32, i32) {
    %c0_i32 = arith.constant 0 : i32
    return %arg0, %arg1 : i32, i32
  }
}

</mosaic_0001>

<bundles_post_ra>
// kernel: one_vs_all.1
= control target key start
LH: loop header
LB: loop body
LE: loop exit
PB: predicated region body
PF: predicated region fallthrough
CT: control target
= control target key end

     0   :  { %vm257_vm0 = vcmask 130048   ;;  %s641_s1 = inlined_call_operand.vmem [shape: f32[768,128], index: 1, kind: input, shape index: {}]   ;;  %s642_s0 = inlined_call_operand.vmem [shape: f32[16,768], index: 0, kind: input, shape index: {}]   ;;  %s643_s2 = inlined_call_operand.vmem [shape: f32[16,16], index: 2, kind: output, shape index: {}]  }
   0x1   :  { %v38_v0 = vld [vmem:[%s641_s1 + $0x78] sm:$0xff]  ;;  %v37_v2 = vld [vmem:[%s641_s1 + $0x70] sm:$0xff]  ;;  %v36_v6 = vld [vmem:[%s641_s1 + $0x68] sm:$0xff] }
   0x2   :  { %v70_v1 = vld [vmem:[%s641_s1 + $0x178] sm:$0xff]  ;;  %119 = vmatpush.msra.mxu0 %v38_v0  ;;  %v69_v4 = vld [vmem:[%s641_s1 + $0x170] sm:$0xff]  ;;  %v68_v8 = vld [vmem:[%s641_s1 + $0x168] sm:$0xff] }
   0x3   :  { %165 = vmatpush.msra.mxu2 %v70_v1  ;;  %v54_v3 = vld [vmem:[%s641_s1 + $0xf8] sm:$0xff]  ;;  %v53_v7 = vld [vmem:[%s641_s1 + $0xf0] sm:$0xff]  ;;  %v52_v10 = vld [vmem:[%s641_s1 + $0xe8] sm:$0xff] }
   0x4   :  { %v86_v5 = vld [vmem:[%s641_s1 + $0x1f8] sm:$0xff]  ;;  %142 = vmatpush.msra.mxu1 %v54_v3  ;;  %120 = vmatpush.msra.mxu0 %v37_v2  ;;  %v85_v9 = vld [vmem:[%s641_s1 + $0x1f0] sm:$0xff]  ;;  %v35_v11 = vld [vmem:[%s641_s1 + $0x60] sm:$0xff] }
   0x5   :  { %188 = vmatpush.msra.mxu3 %v86_v5  ;;  %166 = vmatpush.msra.mxu2 %v69_v4  ;;  %v67_v12 = vld [vmem:[%s641_s1 + $0x160] sm:$0xff]  ;;  %v84_v13 = vld [vmem:[%s641_s1 + $0x1e8] sm:$0xff]  ;;  %v34_v16 = vld [vmem:[%s641_s1 + $0x58] sm:$0xff] }
   0x6   :  { %143 = vmatpush.msra.mxu1 %v53_v7  ;;  %121 = vmatpush.msra.mxu0 %v36_v6  ;;  %v51_v14 = vld [vmem:[%s641_s1 + $0xe0] sm:$0xff]  ;;  %v66_v17 = vld [vmem:[%s641_s1 + $0x158] sm:$0xff]  ;;  %v33_v20 = vld [vmem:[%s641_s1 + $0x50] sm:$0xff] }
   0x7   :  { %189 = vmatpush.msra.mxu3 %v85_v9  ;;  %167 = vmatpush.msra.mxu2 %v68_v8  ;;  %v83_v15 = vld [vmem:[%s641_s1 + $0x1e0] sm:$0xff]  ;;  %v50_v18 = vld [vmem:[%s641_s1 + $0xd8] sm:$0xff]  ;;  %v65_v21 = vld [vmem:[%s641_s1 + $0x150] sm:$0xff] }
   0x8   :  { %144 = vmatpush.msra.mxu1 %v52_v10  ;;  %122 = vmatpush.msra.mxu0 %v35_v11  ;;  %v82_v19 = vld [vmem:[%s641_s1 + $0x1d8] sm:$0xff]  ;;  %v49_v22 = vld [vmem:[%s641_s1 + $0xd0] sm:$0xff]  ;;  %v32_v24 = vld [vmem:[%s641_s1 + $0x48] sm:$0xff] }
   0x9   :  { %190 = vmatpush.msra.mxu3 %v84_v13  ;;  %168 = vmatpush.msra.mxu2 %v67_v12  ;;  %v81_v23 = vld [vmem:[%s641_s1 + $0x1d0] sm:$0xff]  ;;  %v64_v25 = vld [vmem:[%s641_s1 + $0x148] sm:$0xff]  ;;  %v31_v28 = vld [vmem:[%s641_s1 + $0x40] sm:$0xff] }
   0xa   :  { %145 = vmatpush.msra.mxu1 %v51_v14  ;;  %123 = vmatpush.msra.mxu0 %v34_v16  ;;  %v48_v26 = vld [vmem:[%s641_s1 + $0xc8] sm:$0xff]  ;;  %v63_v29 = vld [vmem:[%s641_s1 + $0x140] sm:$0xff]  ;;  %v30_v32 = vld [vmem:[%s641_s1 + $0x38] sm:$0xff] }
   0xb   :  { %191 = vmatpush.msra.mxu3 %v83_v15  ;;  %169 = vmatpush.msra.mxu2 %v66_v17  ;;  %v80_v27 = vld [vmem:[%s641_s1 + $0x1c8] sm:$0xff]  ;;  %v47_v30 = vld [vmem:[%s641_s1 + $0xc0] sm:$0xff]  ;;  %v62_v33 = vld [vmem:[%s641_s1 + $0x138] sm:$0xff] }
   0xc   :  { %146 = vmatpush.msra.mxu1 %v50_v18  ;;  %124 = vmatpush.msra.mxu0 %v33_v20  ;;  %v79_v31 = vld [vmem:[%s641_s1 + $0x1c0] sm:$0xff]  ;;  %v46_v34 = vld [vmem:[%s641_s1 + $0xb8] sm:$0xff]  ;;  %v29_v36 = vld [vmem:[%s641_s1 + $0x30] sm:$0xff] }
   0xd   :  { %192 = vmatpush.msra.mxu3 %v82_v19  ;;  %170 = vmatpush.msra.mxu2 %v65_v21  ;;  %v78_v35 = vld [vmem:[%s641_s1 + $0x1b8] sm:$0xff]  ;;  %v61_v37 = vld [vmem:[%s641_s1 + $0x130] sm:$0xff]  ;;  %v28_v40 = vld [vmem:[%s641_s1 + $0x28] sm:$0xff] }
   0xe   :  { %147 = vmatpush.msra.mxu1 %v49_v22  ;;  %125 = vmatpush.msra.mxu0 %v32_v24  ;;  %v45_v38 = vld [vmem:[%s641_s1 + $0xb0] sm:$0xff]  ;;  %v60_v41 = vld [vmem:[%s641_s1 + $0x128] sm:$0xff]  ;;  %v27_v44 = vld [vmem:[%s641_s1 + $0x20] sm:$0xff] }
   0xf   :  { %193 = vmatpush.msra.mxu3 %v81_v23  ;;  %171 = vmatpush.msra.mxu2 %v64_v25  ;;  %v77_v39 = vld [vmem:[%s641_s1 + $0x1b0] sm:$0xff]  ;;  %v44_v42 = vld [vmem:[%s641_s1 + $0xa8] sm:$0xff]  ;;  %v59_v45 = vld [vmem:[%s641_s1 + $0x120] sm:$0xff] }
  0x10   :  { %148 = vmatpush.msra.mxu1 %v48_v26  ;;  %126 = vmatpush.msra.mxu0 %v31_v28  ;;  %v76_v43 = vld [vmem:[%s641_s1 + $0x1a8] sm:$0xff]  ;;  %v43_v46 = vld [vmem:[%s641_s1 + $0xa0] sm:$0xff]  ;;  %v26_v48 = vld [vmem:[%s641_s1 + $0x18] sm:$0xff] }
  0x11   :  { %194 = vmatpush.msra.mxu3 %v80_v27  ;;  %172 = vmatpush.msra.mxu2 %v63_v29  ;;  %v75_v47 = vld [vmem:[%s641_s1 + $0x1a0] sm:$0xff]  ;;  %v58_v49 = vld [vmem:[%s641_s1 + $0x118] sm:$0xff]  ;;  %v25_v52 = vld [vmem:[%s641_s1 + $0x10] sm:$0xff] }
  0x12   :  { %149 = vmatpush.msra.mxu1 %v47_v30  ;;  %127 = vmatpush.msra.mxu0 %v30_v32  ;;  %v42_v50 = vld [vmem:[%s641_s1 + $0x98] sm:$0xff]  ;;  %v57_v53 = vld [vmem:[%s641_s1 + $0x110] sm:$0xff]  ;;  %v24_v56 = vld [vmem:[%s641_s1 + $0x8] sm:$0xff] }
  0x13   :  { %195 = vmatpush.msra.mxu3 %v79_v31  ;;  %173 = vmatpush.msra.mxu2 %v62_v33  ;;  %v74_v51 = vld [vmem:[%s641_s1 + $0x198] sm:$0xff]  ;;  %v41_v54 = vld [vmem:[%s641_s1 + $0x90] sm:$0xff]  ;;  %v56_v57 = vld [vmem:[%s641_s1 + $0x108] sm:$0xff] }
  0x14   :  { %150 = vmatpush.msra.mxu1 %v46_v34  ;;  %128 = vmatpush.msra.mxu0 %v29_v36  ;;  %v73_v55 = vld [vmem:[%s641_s1 + $0x190] sm:$0xff]  ;;  %v40_v58 = vld [vmem:[%s641_s1 + $0x88] sm:$0xff]  ;;  %v23_v60 = vld [vmem:[%s641_s1] sm:$0xff] }
  0x15   :  { %196 = vmatpush.msra.mxu3 %v78_v35  ;;  %174 = vmatpush.msra.mxu2 %v61_v37  ;;  %v72_v59 = vld [vmem:[%s641_s1 + $0x188] sm:$0xff]  ;;  %v55_v61 = vld [vmem:[%s641_s1 + $0x100] sm:$0xff]  ;;  %v102_v62 = vld [vmem:[%s641_s1 + $0x278] sm:$0xff] }
  0x16   :  { %151 = vmatpush.msra.mxu1 %v45_v38  ;;  %129 = vmatpush.msra.mxu0 %v28_v40  ;;  %v39_v63 = vld [vmem:[%s641_s1 + $0x80] sm:$0xff]  ;;  %v101_v1 = vld [vmem:[%s641_s1 + $0x270] sm:$0xff]  ;;  %v118_v2 = vld [vmem:[%s641_s1 + $0x2f8] sm:$0xff] }
  0x17   :  { %197 = vmatpush.msra.mxu3 %v77_v39  ;;  %175 = vmatpush.msra.mxu2 %v60_v41  ;;  %v71_v0 = vld [vmem:[%s641_s1 + $0x180] sm:$0xff]  ;;  %v100_v3 = vld [vmem:[%s641_s1 + $0x268] sm:$0xff]  ;;  %v117_v4 = vld [vmem:[%s641_s1 + $0x2f0] sm:$0xff] }
  0x18   :  { %152 = vmatpush.msra.mxu1 %v44_v42  ;;  %130 = vmatpush.msra.mxu0 %v27_v44  ;;  %v99_v5 = vld [vmem:[%s641_s1 + $0x260] sm:$0xff]  ;;  %v116_v6 = vld [vmem:[%s641_s1 + $0x2e8] sm:$0xff]  ;;  %v98_v7 = vld [vmem:[%s641_s1 + $0x258] sm:$0xff] }
  0x19   :  { %198 = vmatpush.msra.mxu3 %v76_v43  ;;  %176 = vmatpush.msra.mxu2 %v59_v45  ;;  %v115_v8 = vld [vmem:[%s641_s1 + $0x2e0] sm:$0xff]  ;;  %v97_v9 = vld [vmem:[%s641_s1 + $0x250] sm:$0xff]  ;;  %v114_v10 = vld [vmem:[%s641_s1 + $0x2d8] sm:$0xff] }
  0x1a   :  { %153 = vmatpush.msra.mxu1 %v43_v46  ;;  %131 = vmatpush.msra.mxu0 %v26_v48  ;;  %v96_v11 = vld [vmem:[%s641_s1 + $0x248] sm:$0xff]  ;;  %v113_v12 = vld [vmem:[%s641_s1 + $0x2d0] sm:$0xff]  ;;  %v95_v13 = vld [vmem:[%s641_s1 + $0x240] sm:$0xff] }
  0x1b   :  { %199 = vmatpush.msra.mxu3 %v75_v47  ;;  %177 = vmatpush.msra.mxu2 %v58_v49  ;;  %v112_v14 = vld [vmem:[%s641_s1 + $0x2c8] sm:$0xff]  ;;  %v11_v15 = vld [vmem:[%s642_s0] sm:$0xff]  ;;  %v13_v16 = vld [vmem:[%s642_s0 + $0x10] sm:$0xff] }
  0x1c   :  { %154 = vmatpush.msra.mxu1 %v42_v50  ;;  %132 = vmatpush.msra.mxu0 %v25_v52  ;;  %v94_v17 = vld [vmem:[%s641_s1 + $0x238] sm:$0xff]  ;;  %v111_v18 = vld [vmem:[%s641_s1 + $0x2c0] sm:$0xff]  ;;  %v12_v19 = vld [vmem:[%s642_s0 + $0x8] sm:$0xff] }
  0x1d   :  { %200 = vmatpush.msra.mxu3 %v74_v51  ;;  %178 = vmatpush.msra.mxu2 %v57_v53  ;;  %v14_v20 = vld [vmem:[%s642_s0 + $0x18] sm:$0xff]  ;;  %v93_v21 = vld [vmem:[%s641_s1 + $0x230] sm:$0xff]  ;;  %v92_v23 = vld [vmem:[%s641_s1 + $0x228] sm:$0xff] }
  0x1e   :  { %155 = vmatpush.msra.mxu1 %v41_v54  ;;  %133 = vmatpush.msra.mxu0 %v24_v56  ;;  %v110_v22 = vld [vmem:[%s641_s1 + $0x2b8] sm:$0xff]  ;;  %v109_v24 = vld [vmem:[%s641_s1 + $0x2b0] sm:$0xff]  ;;  %v91_v25 = vld [vmem:[%s641_s1 + $0x220] sm:$0xff] }
  0x1f   :  { %201 = vmatpush.msra.mxu3 %v73_v55  ;;  %179 = vmatpush.msra.mxu2 %v56_v57  ;;  %v108_v26 = vld [vmem:[%s641_s1 + $0x2a8] sm:$0xff]  ;;  %v17_v27 = vld [vmem:[%s642_s0 + $0x30] sm:$0xff]  ;;  %v19_v28 = vld [vmem:[%s642_s0 + $0x40] sm:$0xff] }
  0x20   :  { %156 = vmatpush.msra.mxu1 %v40_v58  ;;  %134 = vmatpush.msra.mxu0 %v23_v60  ;;  %v90_v29 = vld [vmem:[%s641_s1 + $0x218] sm:$0xff]  ;;  %v107_v30 = vld [vmem:[%s641_s1 + $0x2a0] sm:$0xff]  ;;  %v20_v32 = vld [vmem:[%s642_s0 + $0x48] sm:$0xff] }
  0x21   :  { %202 = vmatpush.msra.mxu3 %v72_v59  ;;  %180 = vmatpush.msra.mxu2 %v55_v61  ;;  %v18_v31 = vld [vmem:[%s642_s0 + $0x38] sm:$0xff]  ;;  %v89_v33 = vld [vmem:[%s641_s1 + $0x210] sm:$0xff]  ;;  %v88_v35 = vld [vmem:[%s641_s1 + $0x208] sm:$0xff] }
  0x22   :  { %211 = vmatpush.msrb.mxu0 %v102_v62  ;;  %157 = vmatpush.msra.mxu1 %v39_v63  ;;  %v106_v34 = vld [vmem:[%s641_s1 + $0x298] sm:$0xff]  ;;  %v105_v36 = vld [vmem:[%s641_s1 + $0x290] sm:$0xff]  ;;  %v87_v37 = vld [vmem:[%s641_s1 + $0x200] sm:$0xff] }
  0x23   :  { %264 = vmatpush.msrb.mxu2 %v102_v62  ;;  %203 = vmatpush.msra.mxu3 %v71_v0  ;;  %v104_v38 = vld [vmem:[%s641_s1 + $0x288] sm:$0xff]  ;;  %v15_v39 = vld [vmem:[%s642_s0 + $0x20] sm:$0xff]  ;;  %v21_v40 = vld [vmem:[%s642_s0 + $0x50] sm:$0xff] }
  0x24   :  { %212 = vmatpush.msrb.mxu0 %v101_v1  ;;  %234 = vmatpush.msrb.mxu1 %v118_v2  ;;  %v103_v41 = vld [vmem:[%s641_s1 + $0x280] sm:$0xff]  ;;  %v16_v42 = vld [vmem:[%s642_s0 + $0x28] sm:$0xff]  ;;  %v22_v43 = vld [vmem:[%s642_s0 + $0x58] sm:$0xff] }
  0x25   :  { %265 = vmatpush.msrb.mxu2 %v101_v1  ;;  %280 = vmatpush.msrb.mxu3 %v118_v2 }
  0x26   :  { %213 = vmatpush.msrb.mxu0 %v100_v3  ;;  %235 = vmatpush.msrb.mxu1 %v117_v4 }
  0x27   :  { %266 = vmatpush.msrb.mxu2 %v100_v3  ;;  %281 = vmatpush.msrb.mxu3 %v117_v4 }
  0x28   :  { %214 = vmatpush.msrb.mxu0 %v99_v5  ;;  %236 = vmatpush.msrb.mxu1 %v116_v6 }
  0x29   :  { %267 = vmatpush.msrb.mxu2 %v99_v5  ;;  %282 = vmatpush.msrb.mxu3 %v116_v6 }
  0x2a   :  { %215 = vmatpush.msrb.mxu0 %v98_v7  ;;  %237 = vmatpush.msrb.mxu1 %v115_v8 }
  0x2b   :  { %268 = vmatpush.msrb.mxu2 %v98_v7  ;;  %283 = vmatpush.msrb.mxu3 %v115_v8 }
  0x2c   :  { %216 = vmatpush.msrb.mxu0 %v97_v9  ;;  %238 = vmatpush.msrb.mxu1 %v114_v10 }
  0x2d   :  { %269 = vmatpush.msrb.mxu2 %v97_v9  ;;  %284 = vmatpush.msrb.mxu3 %v114_v10 }
  0x2e   :  { %217 = vmatpush.msrb.mxu0 %v96_v11  ;;  %239 = vmatpush.msrb.mxu1 %v113_v12 }
  0x2f   :  { %270 = vmatpush.msrb.mxu2 %v96_v11  ;;  %285 = vmatpush.msrb.mxu3 %v113_v12 }
  0x30   :  { %218 = vmatpush.msrb.mxu0 %v95_v13  ;;  %240 = vmatpush.msrb.mxu1 %v112_v14 }
  0x31   :  { %271 = vmatpush.msrb.mxu2 %v95_v13  ;;  %286 = vmatpush.msrb.mxu3 %v112_v14 }
  0x32   :  { %135 = vmatmul.f32.vlgmr.msra.gmra.mxu0 %v11_v15  ;;  %181 = vmatmul.f32.vlgmr.msra.gmra.mxu2 %v13_v16 }
  0x33   :  { %219 = vmatpush.msrb.mxu0 %v94_v17  ;;  %272 = vmatpush.msrb.mxu2 %v94_v17 }
  0x34   :  { %241 = vmatpush.msrb.mxu1 %v111_v18  ;;  %287 = vmatpush.msrb.mxu3 %v111_v18 }
  0x35   :  { %158 = vmatmul.f32.vlgmr.msra.gmra.mxu1 %v12_v19  ;;  %204 = vmatmul.f32.vlgmr.msra.gmra.mxu3 %v14_v20 }
  0x36   :  { %220 = vmatpush.msrb.mxu0 %v93_v21  ;;  %273 = vmatpush.msrb.mxu2 %v93_v21 }
  0x37   :  { %242 = vmatpush.msrb.mxu1 %v110_v22  ;;  %288 = vmatpush.msrb.mxu3 %v110_v22 }
  0x38   :  { %221 = vmatpush.msrb.mxu0 %v92_v23  ;;  %274 = vmatpush.msrb.mxu2 %v92_v23 }
  0x39   :  { %243 = vmatpush.msrb.mxu1 %v109_v24  ;;  %289 = vmatpush.msrb.mxu3 %v109_v24 }
  0x3a   :  { %222 = vmatpush.msrb.mxu0 %v91_v25  ;;  %275 = vmatpush.msrb.mxu2 %v91_v25 }
  0x3b   :  { %244 = vmatpush.msrb.mxu1 %v108_v26  ;;  %290 = vmatpush.msrb.mxu3 %v108_v26 }
  0x3c   :  { %138 = vmatmul.f32.gmra.mxu0 %v17_v27  ;;  %184 = vmatmul.f32.gmra.mxu2 %v19_v28 }
  0x3d   :  { %223 = vmatpush.msrb.mxu0 %v90_v29  ;;  %276 = vmatpush.msrb.mxu2 %v90_v29 }
  0x3e   :  { %245 = vmatpush.msrb.mxu1 %v107_v30  ;;  %291 = vmatpush.msrb.mxu3 %v107_v30 }
  0x3f   :  { %161 = vmatmul.f32.gmra.mxu1 %v18_v31  ;;  %207 = vmatmul.f32.gmra.mxu3 %v20_v32 }
  0x40   :  { %224 = vmatpush.msrb.mxu0 %v89_v33  ;;  %277 = vmatpush.msrb.mxu2 %v89_v33 }
  0x41   :  { %246 = vmatpush.msrb.mxu1 %v106_v34  ;;  %292 = vmatpush.msrb.mxu3 %v106_v34 }
  0x42   :  { %225 = vmatpush.msrb.mxu0 %v88_v35  ;;  %278 = vmatpush.msrb.mxu2 %v88_v35 }
  0x43   :  { %247 = vmatpush.msrb.mxu1 %v105_v36  ;;  %293 = vmatpush.msrb.mxu3 %v105_v36 }
  0x44   :  { %226 = vmatpush.msrb.mxu0 %v87_v37  ;;  %279 = vmatpush.msrb.mxu2 %v87_v37 }
  0x45   :  { %248 = vmatpush.msrb.mxu1 %v104_v38  ;;  %294 = vmatpush.msrb.mxu3 %v104_v38 }
  0x46   :  { %227 = vmatmul.f32.vlgmr.msrb.gmra.mxu0 %v15_v39  ;;  %230 = vmatmul.f32.vlgmr.msrb.gmra.mxu2 %v21_v40 }
  0x47   :  { %249 = vmatpush.msrb.mxu1 %v103_v41  ;;  %295 = vmatpush.msrb.mxu3 %v103_v41 }
  0x48   :  { %250 = vmatmul.f32.vlgmr.msrb.gmra.mxu1 %v16_v42  ;;  %253 = vmatmul.f32.vlgmr.msrb.gmra.mxu3 %v22_v43 }
  0xaf   :  { %v136_v44 = vpop.f32.mrf.mxu0 }
  0xb2   :  { %v159_v45 = vpop.f32.mrf.mxu1 }
  0xb3   :  { %v160_v49 = vadd.f32 %v159_v45, %v136_v44 }
  0xb5   :  { %v182_v46 = vpop.f32.mrf.mxu2 }
  0xb6   :  { %v183_v51 = vadd.f32 %v182_v46, %v160_v49 }
  0xb8   :  { %v205_v47 = vpop.f32.mrf.mxu3 }
  0xb9   :  { %v139_v48 = vpop.f32.mrf.mxu0  ;;  %v206_v54 = vadd.f32 %v205_v47, %v183_v51 }
  0xbc   :  { %v162_v50 = vpop.f32.mrf.mxu1 }
  0xbd   :  { %v163_v53 = vadd.f32 %v162_v50, %v139_v48 }
  0xbf   :  { %v185_v52 = vpop.f32.mrf.mxu2 }
  0xc0   :  { %v186_v57 = vadd.f32 %v185_v52, %v163_v53 }
  0xc2   :  { %v208_v55 = vpop.f32.mrf.mxu3 }
  0xc3   :  { %v228_v56 = vpop.f32.mrf.mxu0  ;;  %v209_v61 = vadd.f32 %v208_v55, %v186_v57 }
  0xc4   :  { %v229_v58 = vadd.f32 %v228_v56, %v206_v54 }
  0xc5   :  { %v251_v59 = vpop.f32.mrf.mxu1 }
  0xc6   :  { %v252_v60 = vadd.f32 %v251_v59, %v229_v58 }
  0xc8   :  { %258 = vst.msk [vmem:[%s643_s2] sm:$0xff] %vm257_vm0, %v252_v60 }
  0xc9   :  { %v231_v62 = vpop.f32.mrf.mxu2 }
  0xca   :  { %v232_v63 = vadd.f32 %v231_v62, %v209_v61 }
  0xcb   :  { %v254_v0 = vpop.f32.mrf.mxu3 }
  0xcc   :  { %v255_v1 = vadd.f32 %v254_v0, %v232_v63 }
  0xce   :  { %259 = vst.msk [vmem:[%s643_s2 + $0x8] sm:$0xff] %vm257_vm0, %v255_v1 }

</bundles_post_ra>
